<compile_context>
chip_gen: v5e
topology: v5e:2x2
jax: 0.10.0
libtpu: 0.0.40
codegen_flags: <defaults>
</compile_context>

<pallas_src>
import functools

import jax
import jax.numpy as jnp
import numpy as np
from jax.experimental import pallas as pl
from jax.experimental.pallas import tpu as pltpu


# ---------------------------------------------------------------------------
# Device-dependent tuning (resolved once per process).
# ---------------------------------------------------------------------------
@functools.lru_cache(maxsize=1)
def _device_tuning():
    try:
        kind = jax.devices()[0].device_kind.lower()
    except Exception:  # pragma: no cover - defensive
        kind = ""
    is_v5e = ("v5 lite" in kind) or ("v5e" in kind) or ("v5litepod" in kind)
    multi_tc = "v7" in kind  # 2 TensorCores per chip
    # Per-block bytes.  Double-buffered in + out => 4x this in scoped VMEM:
    #   v5e: 4 x 2 MiB = 8 MiB  (< 16 MiB default scoped VMEM)
    #   v6e/v7x: 4 x 4 MiB = 16 MiB (< 32 MiB default scoped VMEM)
    block_bytes = (2 << 20) if is_v5e else (4 << 20)
    return block_bytes, multi_tc


# ---------------------------------------------------------------------------
# Path 2: zero-copy identity (output aliases the donated input buffer).
# ---------------------------------------------------------------------------
def _noop_alias_kernel(x_ref, o_ref):
    # Output aliases the input HBM buffer, so there is nothing to move.
    # touch() pins a fake read/write dependency so the aliased output
    # materializes; has_side_effects=True keeps it from being elided.
    del x_ref
    pltpu.touch(o_ref)


def _build_aliased_call(shape, dtype):
    return pl.pallas_call(
        _noop_alias_kernel,
        out_shape=jax.ShapeDtypeStruct(shape, dtype),
        in_specs=[pl.BlockSpec(memory_space=pl.ANY)],   # raw HBM ref, no auto-DMA
        out_specs=pl.BlockSpec(memory_space=pl.ANY),
        input_output_aliases={0: 0},                    # out buffer == in buffer
        compiler_params=pltpu.CompilerParams(has_side_effects=True),
        cost_estimate=pl.CostEstimate(flops=0, transcendentals=0, bytes_accessed=0),
    )


# Cache of ("alias", compiled) or ("copy", None) per (shape, dtype): the
# aliased no-op is compiled once via .lower().compile(); if it cannot be
# lowered on this backend we permanently fall back to the roofline copy.
_ALIAS_CACHE = {}


def _identity_donated(x):
    key = (tuple(x.shape), jnp.dtype(x.dtype).name)
    entry = _ALIAS_CACHE.get(key)
    if entry is None:
        try:
            jitted = jax.jit(_build_aliased_call(x.shape, x.dtype), donate_argnums=0)
            compiled = jitted.lower(jax.ShapeDtypeStruct(x.shape, x.dtype)).compile()
            entry = ("alias", compiled)
        except Exception:
            entry = ("copy", None)
        _ALIAS_CACHE[key] = entry
    mode, compiled = entry
    if mode == "alias":
        return compiled(x)
    return _identity_copy(x)


# ---------------------------------------------------------------------------
# Path 3: lane-dense tiled HBM -> VMEM -> HBM copy at ~HBM roofline.
# ---------------------------------------------------------------------------
def _copy_kernel(x_ref, o_ref):
    o_ref[...] = x_ref[...]


def _tiled_copy_2d(flat2d):
    """Pallas copy of a (rows, lane) slab; lane is a multiple of 128."""
    rows, lane = flat2d.shape
    itemsize = jnp.dtype(flat2d.dtype).itemsize
    block_bytes, multi_tc = _device_tuning()

    sub = max(8, 32 // itemsize)                 # sublane granule for packed dtypes
    row_bytes = lane * itemsize
    block_rows = max(sub, (block_bytes // row_bytes) // sub * sub)
    if block_rows >= rows:
        block_rows = rows                        # full-extent block is always legal
    grid_n = pl.cdiv(rows, block_rows)

    # Engage both TensorCores on v7x only when the grid splits into >= 2
    # evenly-sized steps; otherwise plain "parallel" (single-TC chips).
    core_parallel = getattr(pltpu, "CORE_PARALLEL", None)
    if multi_tc and core_parallel is not None and grid_n >= 2 and rows % block_rows == 0:
        sems = (core_parallel,)
    else:
        sems = ("parallel",)

    return pl.pallas_call(
        _copy_kernel,
        out_shape=jax.ShapeDtypeStruct((rows, lane), flat2d.dtype),
        grid=(grid_n,),
        in_specs=[pl.BlockSpec((block_rows, lane), lambda i: (i, 0))],
        out_specs=pl.BlockSpec((block_rows, lane), lambda i: (i, 0)),
        compiler_params=pltpu.CompilerParams(dimension_semantics=sems),
        cost_estimate=pl.CostEstimate(
            flops=0, transcendentals=0,
            bytes_accessed=2 * rows * lane * itemsize),
    )(flat2d)


@jax.jit
def _identity_copy(x):
    """Identity implemented as a roofline-rate Pallas copy (x stays valid)."""
    n = x.size
    if n == 0:
        return x
    orig_shape = x.shape
    flat = x.reshape(-1)                         # bitcast inside jit, no traffic

    # Common case: element count is a multiple of 128 -> widest lane-dense
    # reshape, no padding, no slicing, no extra HBM passes.
    lane = next((L for L in (1024, 512, 256, 128) if n % L == 0), None)
    if lane is not None:
        out = _tiled_copy_2d(flat.reshape(n // lane, lane))
        return out.reshape(orig_shape)

    # Rare: size not a multiple of 128.  Pad to one 128-lane boundary, copy,
    # drop the tail.  This pays the pad/slice passes but only triggers on
    # oddly-sized tensors (usually tiny, e.g. the bf16 test below).
    padded = pl.cdiv(n, 128) * 128
    flat = jnp.pad(flat, (0, padded - n))
    out = _tiled_copy_2d(flat.reshape(padded // 128, 128))
    return out.reshape(-1)[:n].reshape(orig_shape)


# ---------------------------------------------------------------------------
# Public forward: EBMLearner.forward(x) == x
# ---------------------------------------------------------------------------
_TRACER_TYPES = getattr(jax.core, "Tracer", ())


def ebm_learner_forward(x, *, donate=False):
    """Pallas implementation of EBMLearner.forward: identity on x.

    donate=False (default): returns a fresh array equal to x via a roofline
        tiled Pallas copy; the caller's x buffer stays valid (PyTorch-like).
    donate=True: zero-copy aliased no-op kernel; x's buffer is donated to the
        output (do not use x afterwards).
    Inside an outer jit trace the identity is returned directly (free).
    """
    if isinstance(x, _TRACER_TYPES):
        return x
    if donate:
        return _identity_donated(x)
    return _identity_copy(x)


if __name__ == "__main__":
    key = jax.random.PRNGKey(0)
    x = jax.random.normal(key, (2, 4, 16, 16), dtype=jnp.float32)
    expected = np.asarray(x)

    # Default (safe) path: Pallas tiled copy; caller's x stays valid.
    y = jax.block_until_ready(ebm_learner_forward(x))
    assert y.shape == expected.shape, (y.shape, expected.shape)
    assert y.dtype == expected.dtype, (y.dtype, expected.dtype)
    assert np.array_equal(np.asarray(y), expected), "identity copy mismatch"
    assert np.array_equal(np.asarray(x), expected), "input buffer was clobbered"

    # Zero-copy donated path (output aliases the donated input buffer).
    x2 = jnp.array(expected)
    y2 = jax.block_until_ready(ebm_learner_forward(x2, donate=True))
    assert np.array_equal(np.asarray(y2), expected), "aliased identity mismatch"

    # Oddly-sized bf16 input exercises the non-128-aligned fallback.
    x3 = jax.random.normal(jax.random.PRNGKey(1), (3, 5, 7), dtype=jnp.bfloat16)
    e3 = np.asarray(x3, dtype=np.float32)
    y3 = jax.block_until_ready(ebm_learner_forward(x3))
    assert np.array_equal(np.asarray(y3, dtype=np.float32), e3), "odd-shape mismatch"

    print("KERNEL_OK")
</pallas_src>

<mosaic_0001>
module attributes {stable_mosaic.version = 11 : i64} {
  func.func @_copy_kernel(%arg0: i32, %arg1: memref<2x1024xf32, #tpu.memory_space<vmem>>, %arg2: memref<2x1024xf32, #tpu.memory_space<vmem>>) attributes {dimension_semantics = [#tpu.dimension_semantics<parallel>], iteration_bounds = array<i64: 1>, scalar_prefetch = 0 : i64, scratch_operands = 0 : i64, tpu.core_type = #tpu.core_type<tc>, window_params = [{transform_indices = @transform_0, window_bounds = array<i64: 2, 1024>}, {transform_indices = @transform_1, window_bounds = array<i64: 2, 1024>}]} {
    %c0 = arith.constant 0 : index
    %c0_0 = arith.constant 0 : index
    %0 = vector.load %arg1[%c0, %c0_0] : memref<2x1024xf32, #tpu.memory_space<vmem>>, vector<2x1024xf32>
    %c0_1 = arith.constant 0 : index
    %c0_2 = arith.constant 0 : index
    %1 = vector.load %arg2[%c0_1, %c0_2] : memref<2x1024xf32, #tpu.memory_space<vmem>>, vector<2x1024xf32>
    tpu.vector_store %arg2[%c0_1, %c0_2], %0 {strides = array<i32>} : memref<2x1024xf32, #tpu.memory_space<vmem>>, vector<2x1024xf32>,
    return
  }
  func.func @transform_0(%arg0: i32) -> (i32, i32) {
    %c0_i32 = arith.constant 0 : i32
    %c0_i32_0 = arith.constant 0 : i32
    return %arg0, %c0_i32 : i32, i32
  }
  func.func @transform_1(%arg0: i32) -> (i32, i32) {
    %c0_i32 = arith.constant 0 : i32
    %c0_i32_0 = arith.constant 0 : i32
    return %arg0, %c0_i32 : i32, i32
  }
}

</mosaic_0001>

<bundles_post_ra>
// kernel: _identity_copy.1
= control target key start
LH: loop header
LB: loop body
LE: loop exit
PB: predicated region body
PF: predicated region fallthrough
CT: control target
= control target key end

     0   :  { %s38_s0 = inlined_call_operand.vmem [shape: f32[2,1024], index: 0, kind: input, shape index: {}]   ;;  %s39_s1 = inlined_call_operand.vmem [shape: f32[2,1024], index: 1, kind: output, shape index: {}]  }
   0x1   :  { %v8_v0 = vld [vmem:[%s38_s0] sm:$0xff]  ;;  %v9_v1 = vld [vmem:[%s38_s0 + $0x8] sm:$0xff] }
   0x2   :  { %10 = vst [vmem:[%s39_s1] sm:$0xff] %v8_v0 }
   0x3   :  { %11 = vst [vmem:[%s39_s1 + $0x8] sm:$0xff] %v9_v1 }

</bundles_post_ra>
